<compile_context>
chip_gen: v5e
topology: v5e:2x2
jax: 0.10.0
libtpu: 0.0.40
codegen_flags: <defaults>
</compile_context>

<pallas_src>
import functools

import jax
import jax.numpy as jnp
import numpy as np
from jax.experimental import pallas as pl
from jax.experimental.pallas import tpu as pltpu


def _sublane_multiple(dtype):
    """Native sublane packing multiple: 8 for 32-bit, 16 for bf16, 32 for 8-bit."""
    itemsize = jnp.dtype(dtype).itemsize
    if itemsize >= 4:
        return 8
    if itemsize == 2:
        return 16
    return 32


def _vmem_budgets():
    """(scoped vmem limit, double-buffered working-set budget) per chip gen."""
    cap = 64 * 1024 * 1024                      # conservative fallback (v7x-sized)
    try:
        cap = int(pltpu.get_tpu_info().vmem_capacity_bytes)
    except Exception:
        pass
    # Leave ~24 MiB headroom for compiler-internal scratch; cap at 96 MiB.
    #   v7x (64 MiB/TC)  -> limit 40 MiB, working set 28 MiB
    #   v5e/v6e (128 MiB)-> limit 96 MiB, working set 84 MiB
    limit = max(min(cap - 24 * 1024 * 1024, 96 * 1024 * 1024), 16 * 1024 * 1024)
    working = max(limit - 12 * 1024 * 1024, 8 * 1024 * 1024)
    return limit, working


def _choose_tile_rows(rows, d, itemsize, *, n_streams, sublane, budget):
    """Largest sublane-aligned row tile whose double-buffered streams fit budget,
    capped so large grids keep >= 4 steps (megacore load balance on v7x)."""
    bytes_per_row = max(1, n_streams * 2 * d * itemsize)   # x2: double-buffered
    max_rows = max(sublane, (budget // bytes_per_row) // sublane * sublane)
    if rows > 4 * sublane:
        balance_cap = -(-rows // 4)                        # ceil(rows / 4)
        balance_cap = -(-balance_cap // sublane) * sublane # round up to sublane
        max_rows = min(max_rows, max(sublane, balance_cap))
    if max_rows >= rows:
        return rows                # single tile; block == full dim is allowed
    return max(sublane, (max_rows // sublane) * sublane)


def _layernorm_kernel(alpha_ref, bias_ref, x_ref, o_ref, *, eps):
    # x_ref: (TR, D) tile in VMEM; alpha/bias are (1,) scalars in SMEM.
    x = x_ref[...].astype(jnp.float32)
    d = x.shape[-1]
    alpha = alpha_ref[0]                       # hoisted scalar broadcasts
    bias = bias_ref[0]
    mean = jnp.mean(x, axis=-1, keepdims=True)
    xc = x - mean
    # torch.std default is unbiased (ddof=1); guard d == 1 (torch would be nan).
    var = jnp.sum(xc * xc, axis=-1, keepdims=True) * jnp.float32(1.0 / max(d - 1, 1))
    std = jnp.sqrt(var)
    # One divide per ROW (shape (TR,1)); broadcast-multiply across D.
    scale = alpha / (std - jnp.float32(eps))
    o_ref[...] = (xc * scale + bias).astype(o_ref.dtype)


def _residual_dropout_kernel(seed_ref, x_ref, sub_ref, o_ref, *,
                             p, tile_rows, n_cols):
    # x_ref, sub_ref: (TR, W) tiles; seed_ref: (1,) int32 in SMEM.
    x = x_ref[...]
    s = sub_ref[...].astype(x.dtype)           # in-register cast of sublayer dtype
    if p >= 1.0:                                # trace-time: everything dropped
        s = jnp.zeros_like(s)
    elif p > 0.0:                               # trace-time: dropout active
        tr, w = s.shape
        # Absolute flat element index -> mask independent of layout / tiling.
        # Fold tile offset and seed mix into ONE scalar, add it to a (TR,1) row
        # vector; the only full-tile uint32 op building the index is rowv+colv.
        base = (pl.program_id(0).astype(jnp.uint32)
                * jnp.uint32((tile_rows * n_cols) & 0xFFFFFFFF)
                + seed_ref[0].astype(jnp.uint32) * jnp.uint32(0x9E3779B9))
        rowv = (jax.lax.broadcasted_iota(jnp.uint32, (tr, 1), 0)
                * jnp.uint32(n_cols) + base)
        colv = jax.lax.broadcasted_iota(jnp.uint32, (1, w), 1)
        z = rowv + colv
        # lowbias32-style mix (wrapping uint32 arithmetic).
        z = (z ^ (z >> 16)) * jnp.uint32(0x7FEB352D)
        z = (z ^ (z >> 15)) * jnp.uint32(0x846CA68B)
        z = z ^ (z >> 16)
        # Integer-threshold compare: keep with probability (1 - p).
        thr = min(int(round(p * 4294967296.0)), 0xFFFFFFFF)
        keep = z >= jnp.uint32(thr)
        inv_keep = jnp.asarray(1.0 / (1.0 - p), dtype=s.dtype)
        s = jnp.where(keep, s * inv_keep, jnp.zeros_like(s))
    o_ref[...] = (x + s).astype(o_ref.dtype)


def residual_connection(x, sublayer, alpha, bias, *, dropout_p, seed,
                        eps=1e-6, ln_tile_rows=None, drop_tile_rows=None,
                        donate_x=False):
    """x: [B, S, D]. sublayer: plain-JAX callable [B,S,D] -> [B,S,D]."""
    B, S, D = x.shape
    rows = B * S
    x2 = x.reshape(rows, D)
    itemsize = jnp.dtype(x.dtype).itemsize
    sublane = _sublane_multiple(x.dtype)
    vmem_limit, ws_budget = _vmem_budgets()

    smem_spec = pl.BlockSpec(memory_space=pltpu.MemorySpace.SMEM)
    cparams = pltpu.CompilerParams(
        dimension_semantics=("parallel",),     # shard row-grid across TCs on v7x
        vmem_limit_bytes=vmem_limit,
    )

    # ---- Kernel 1: LayerNormalization (2 streams: x in, normed out) ----
    if ln_tile_rows is None:
        ln_tile_rows = _choose_tile_rows(rows, D, itemsize, n_streams=2,
                                         sublane=sublane, budget=ws_budget)
    ln_spec = pl.BlockSpec((ln_tile_rows, D), lambda i: (i, 0))
    normed = pl.pallas_call(
        functools.partial(_layernorm_kernel, eps=float(eps)),
        out_shape=jax.ShapeDtypeStruct((rows, D), x.dtype),
        grid=(pl.cdiv(rows, ln_tile_rows),),
        in_specs=[smem_spec, smem_spec, ln_spec],
        out_specs=ln_spec,
        compiler_params=cparams,
    )(alpha, bias, x2)

    # Arbitrary sublayer — plain JAX glue; no wrapper-side dtype convert
    # (kernel 2 casts in-register).
    # TODO(synk): fuse dropout+residual into the sublayer matmul epilogue when known.
    sub_out = sublayer(normed.reshape(B, S, D)).reshape(rows, D)

    # ---- Kernel 2: out = x + dropout(sub_out) (elementwise) ----
    # Lane-dense view when D under-fills / misaligns the 128-wide lanes: reshape
    # the contiguous row-major buffer to (*, W), W a multiple of 128 (pure layout;
    # the absolute-index hash keeps the dropout mask unchanged).
    r2, w = rows, D
    if D % 128 != 0:
        total = rows * D
        for cand in (1024, 512, 256, 128):
            if total % cand == 0:
                r2, w = total // cand, cand
                break
    x_e = x2.reshape(r2, w)
    s_e = sub_out.reshape(r2, w)

    stream_item = max(itemsize, jnp.dtype(sub_out.dtype).itemsize)
    if drop_tile_rows is None:
        drop_tile_rows = _choose_tile_rows(r2, w, stream_item, n_streams=3,
                                           sublane=sublane, budget=ws_budget)
    d_spec = pl.BlockSpec((drop_tile_rows, w), lambda i: (i, 0))
    out = pl.pallas_call(
        functools.partial(_residual_dropout_kernel, p=float(dropout_p),
                          tile_rows=drop_tile_rows, n_cols=w),
        out_shape=jax.ShapeDtypeStruct((r2, w), x.dtype),
        grid=(pl.cdiv(r2, drop_tile_rows),),
        in_specs=[smem_spec, d_spec, d_spec],
        out_specs=d_spec,
        compiler_params=cparams,
        input_output_aliases=({1: 0} if donate_x else {}),
    )(seed, x_e, s_e)

    return out.reshape(B, S, D)


if __name__ == "__main__":
    B, S, D = 2, 8, 32
    key = jax.random.PRNGKey(0)
    kx, kw = jax.random.split(key)

    x = jax.random.normal(kx, (B, S, D), dtype=jnp.float32)

    # LayerNormalization params (exactly as in __init__: ones(1), zeros(1)).
    alpha = jnp.ones((1,), dtype=jnp.float32)
    bias = jnp.zeros((1,), dtype=jnp.float32)

    # Example sublayer: a simple deterministic linear layer (plain JAX).
    W = jax.random.normal(kw, (D, D), dtype=jnp.float32) * 0.02
    sublayer = lambda h: jnp.einsum("bsd,de->bse", h, W)

    seed = jnp.array([0], dtype=jnp.int32)
    eps = 1e-6

    # Correctness check with dropout disabled (deterministic path) vs pure JAX.
    out_nodrop = residual_connection(x, sublayer, alpha, bias,
                                     dropout_p=0.0, seed=seed, eps=eps)
    mean = jnp.mean(x, axis=-1, keepdims=True)
    std = jnp.std(x, axis=-1, keepdims=True, ddof=1)
    normed_ref = alpha[0] * (x - mean) / (std - eps) + bias[0]
    ref = x + sublayer(normed_ref)
    np.testing.assert_allclose(np.asarray(out_nodrop), np.asarray(ref),
                               rtol=1e-5, atol=1e-5)

    # Run with dropout active (training semantics, tiling-independent mask).
    out = residual_connection(x, sublayer, alpha, bias,
                              dropout_p=0.1, seed=seed, eps=eps)
    jax.block_until_ready(out)
    print("KERNEL_OK")
</pallas_src>

<mosaic_0001>
module attributes {stable_mosaic.version = 11 : i64} {
  func.func @_layernorm_kernel(%arg0: i32, %arg1: memref<1xf32, #tpu.memory_space<smem>>, %arg2: memref<1xf32, #tpu.memory_space<smem>>, %arg3: memref<16x32xf32, #tpu.memory_space<vmem>>, %arg4: memref<16x32xf32, #tpu.memory_space<vmem>>) attributes {dimension_semantics = [#tpu.dimension_semantics<parallel>], iteration_bounds = array<i64: 1>, scalar_prefetch = 0 : i64, scratch_operands = 0 : i64, tpu.core_type = #tpu.core_type<tc>, window_params = [{transform_indices = @transform_0, window_bounds = array<i64: 1>}, {transform_indices = @transform_1, window_bounds = array<i64: 1>}, {transform_indices = @transform_2, window_bounds = array<i64: 16, 32>}, {transform_indices = @transform_3, window_bounds = array<i64: 16, 32>}]} {
    %c0 = arith.constant 0 : index
    %c0_0 = arith.constant 0 : index
    %0 = vector.load %arg3[%c0, %c0_0] : memref<16x32xf32, #tpu.memory_space<vmem>>, vector<16x32xf32>
    %c0_1 = arith.constant 0 : index
    %1 = memref.load %arg1[%c0_1] : memref<1xf32, #tpu.memory_space<smem>>
    %c0_2 = arith.constant 0 : index
    %2 = memref.load %arg2[%c0_2] : memref<1xf32, #tpu.memory_space<smem>>
    %cst = arith.constant dense<0.000000e+00> : vector<16xf32>
    %3 = vector.multi_reduction <add>, %0, %cst [1] : vector<16x32xf32> to vector<16xf32>
    %4 = vector.shape_cast %3 : vector<16xf32> to vector<16x1xf32>
    %cst_3 = arith.constant 3.200000e+01 : f32
    %5 = vector.broadcast %cst_3 : f32 to vector<16x1xf32>
    %6 = arith.divf %4, %5 : vector<16x1xf32>
    %7 = vector.broadcast %6 : vector<16x1xf32> to vector<16x32xf32>
    %8 = arith.subf %0, %7 : vector<16x32xf32>
    %9 = arith.mulf %8, %8 : vector<16x32xf32>
    %cst_4 = arith.constant dense<0.000000e+00> : vector<16xf32>
    %10 = vector.multi_reduction <add>, %9, %cst_4 [1] : vector<16x32xf32> to vector<16xf32>
    %11 = vector.shape_cast %10 : vector<16xf32> to vector<16x1xf32>
    %cst_5 = arith.constant 0.0322580636 : f32
    %12 = vector.broadcast %cst_5 : f32 to vector<16x1xf32>
    %13 = arith.mulf %11, %12 : vector<16x1xf32>
    %14 = math.sqrt %13 : vector<16x1xf32>
    %cst_6 = arith.constant 9.99999997E-7 : f32
    %15 = vector.broadcast %cst_6 : f32 to vector<16x1xf32>
    %16 = arith.subf %14, %15 : vector<16x1xf32>
    %17 = vector.broadcast %1 : f32 to vector<16x1xf32>
    %18 = arith.divf %17, %16 : vector<16x1xf32>
    %19 = vector.broadcast %18 : vector<16x1xf32> to vector<16x32xf32>
    %20 = arith.mulf %8, %19 : vector<16x32xf32>
    %21 = vector.broadcast %2 : f32 to vector<16x32xf32>
    %22 = arith.addf %20, %21 : vector<16x32xf32>
    %c0_7 = arith.constant 0 : index
    %c0_8 = arith.constant 0 : index
    %23 = vector.load %arg4[%c0_7, %c0_8] : memref<16x32xf32, #tpu.memory_space<vmem>>, vector<16x32xf32>
    tpu.vector_store %arg4[%c0_7, %c0_8], %22 {strides = array<i32>} : memref<16x32xf32, #tpu.memory_space<vmem>>, vector<16x32xf32>,
    return
  }
  func.func @transform_0(%arg0: i32) -> i32 {
    %c0_i32 = arith.constant 0 : i32
    %c0_i32_0 = arith.constant 0 : i32
    return %c0_i32 : i32
  }
  func.func @transform_1(%arg0: i32) -> i32 {
    %c0_i32 = arith.constant 0 : i32
    %c0_i32_0 = arith.constant 0 : i32
    return %c0_i32 : i32
  }
  func.func @transform_2(%arg0: i32) -> (i32, i32) {
    %c0_i32 = arith.constant 0 : i32
    %c0_i32_0 = arith.constant 0 : i32
    return %arg0, %c0_i32 : i32, i32
  }
  func.func @transform_3(%arg0: i32) -> (i32, i32) {
    %c0_i32 = arith.constant 0 : i32
    %c0_i32_0 = arith.constant 0 : i32
    return %arg0, %c0_i32 : i32, i32
  }
}

</mosaic_0001>

<bundles_post_ra>
// kernel: tpu_custom_call.1
= control target key start
LH: loop header
LB: loop body
LE: loop exit
PB: predicated region body
PF: predicated region fallthrough
CT: control target
= control target key end

     0   :  { %10 = vsyncpa [#allocation5], 0  ;;  %s276_s0 = inlined_call_operand.<no memory space> [shape: f32[1], index: 0, kind: input, shape index: {}]   ;;  %s277_s1 = inlined_call_operand.<no memory space> [shape: f32[1], index: 1, kind: input, shape index: {}]   ;;  %s278_s2 = inlined_call_operand.hbm [shape: f32[16,32], index: 2, kind: input, shape index: {}]   ;;  %s279_s3 = inlined_call_operand.hbm [shape: f32[16,32], index: 3, kind: output, shape index: {}]  }
   0x1   :  { %11 = vsyncpa [#allocation6], 0  ;;  %s20_s14 = sshll.u32 %s278_s2, 4  ;;  %s217_s15 = smov [#allocation4]   ;;  %s21_s14 = int_to_ptr.hbm [resolvable:$true] %s20_s14 }
   0x2   :  { %s22_s16 = sshll.u32 %s217_s15, 4  ;;  %s218_s17 = smov 128   ;;  %s23_s16 = int_to_ptr.vmem [resolvable:$true] %s22_s16 }
   0x3   :  { %s219_s18 = smov 8  }
   0x4   :  { %28 = dma.hbm_to_vmem [thread:$0]  %s21_s14, 256, %s23_s16, [#allocation5], %s218_s17, %s218_s17, %s219_s18  }
   0x5   :  { %213 = dma.done.wait [#allocation5], 256  }
   0x6   :  { %214 = vsyncadd [#allocation5], 4294967040  ;;  %vm37_vm0 = vcmask 261120   ;;  %v33_v0 = vld [vmem:[#allocation4] sm:$0xff]  ;;  %v34_v2 = vld [vmem:[#allocation4 + $0x8] sm:$0xff]  ;;  %v220_v4 = vmov 32.0   ;;  %v91_v55 = vstv %s276_s0  ;;  %v124_v63 = vstv %s277_s1 }
   0x7   :  { %v38_v1 = vsel %vm37_vm0, %v33_v0, 0.0  ;;  %v41_v3 = vsel %vm37_vm0, %v34_v2, 0.0  ;;  %155 = vrcp.f32 %v220_v4  ;;  %s221_s0 = smov [#allocation7]   ;;  %s135_s24 = sshll.u32 %s279_s3, 4  ;;  %s136_s24 = int_to_ptr.hbm [resolvable:$true] %s135_s24 }
   0x8   :  { %39 = vadd.xlane.f32.xlu0 %v38_v1  ;;  %s133_s22 = sshll.u32 %s221_s0, 4  ;;  %s134_s22 = int_to_ptr.vmem [resolvable:$true] %s133_s22 }
   0xd   :  { %v156_v5 = vpop.eup %155 }
   0xe   :  { %v45_v6 = vmul.f32 32.0, %v156_v5  ;;  %vm49_vm1 = vweird.f32 %v156_v5 }
  0x10   :  { %42 = vadd.xlane.f32.xlu0 %v41_v3  ;;  %v46_v7 = vsub.f32 1.0, %v45_v6 }
  0x12   :  { %v47_v8 = vmul.f32 %v156_v5, %v46_v7 }
  0x14   :  { %v48_v9 = vadd.f32 %v156_v5, %v47_v8 }
  0x16   :  { %v50_v10 = vsel %vm49_vm1, %v156_v5, %v48_v9 }
  0x7b   :  { %v40_v11 = vpop.xlane.xlu0 %39 }
  0x7c   :  { %v51_v12 = vmul.f32 %v50_v10, %v40_v11 }
  0x7e   :  { %v250_v13 = vsub.f32 %v33_v0, %v51_v12 }
  0x80   :  { %v55_v14 = vmul.f32 %v250_v13, %v250_v13 }
  0x82   :  { %v57_v15 = vsel %vm37_vm0, %v55_v14, 0.0 }
  0x83   :  { %58 = vadd.xlane.f32.xlu1 %v57_v15  ;;  %v43_v16 = vpop.xlane.xlu0 %42 }
  0x84   :  { %v52_v17 = vmul.f32 %v50_v10, %v43_v16 }
  0x86   :  { %v255_v18 = vsub.f32 %v34_v2, %v52_v17 }
  0x88   :  { %v56_v19 = vmul.f32 %v255_v18, %v255_v18 }
  0x8a   :  { %v60_v20 = vsel %vm37_vm0, %v56_v19, 0.0 }
  0x8b   :  { %61 = vadd.xlane.f32.xlu1 %v60_v20 }
  0xf6   :  { %v59_v21 = vpop.xlane.xlu1 %58 }
  0xf7   :  { %v63_v22 = vmul.f32 0.032258064, %v59_v21 }
  0xf9   :  { %157 = vrsqrt.f32 %v63_v22  ;;  %vm72_vm2 = vcmp.eq.f32.partialorder %v63_v22, inf  ;;  %v75_v35 = vand.u32 2147483648, %v63_v22  ;;  %vm74_vm3 = vcmp.eq.f32.partialorder %v63_v22, 0.0 }
  0xfe   :  { %v62_v23 = vpop.xlane.xlu1 %61 }
  0xff   :  { %v158_v24 = vpop.eup %157  ;;  %v64_v25 = vmul.f32 0.032258064, %v62_v23 }
 0x100   :  { %v66_v26 = vmul.f32 %v158_v24, %v63_v22 }
 0x101   :  { %159 = vrsqrt.f32 %v64_v25  ;;  %vm84_vm4 = vcmp.eq.f32.partialorder %v64_v25, inf  ;;  %v87_v43 = vand.u32 2147483648, %v64_v25  ;;  %vm86_vm5 = vcmp.eq.f32.partialorder %v64_v25, 0.0 }
 0x102   :  { %v67_v27 = vmul.f32 %v158_v24, %v66_v26 }
 0x104   :  { %v68_v28 = vmul.f32 0.5, %v67_v27 }
 0x106   :  { %v69_v29 = vsub.f32 1.5, %v68_v28 }
 0x107   :  { %v160_v30 = vpop.eup %159 }
 0x108   :  { %v70_v31 = vmul.f32 %v158_v24, %v69_v29  ;;  %v78_v32 = vmul.f32 %v160_v30, %v64_v25 }
 0x10a   :  { %v71_v33 = vmul.f32 %v70_v31, %v63_v22  ;;  %v79_v34 = vmul.f32 %v160_v30, %v78_v32 }
 0x10c   :  { %v73_v36 = vsel %vm72_vm2, %v63_v22, %v71_v33  ;;  %v80_v37 = vmul.f32 0.5, %v79_v34 }
 0x10d   :  { %v76_v38 = vsel %vm74_vm3, %v75_v35, %v73_v36 }
 0x10e   :  { %v148_v39 = vadd.f32 -1e-06, %v76_v38  ;;  %v81_v40 = vsub.f32 1.5, %v80_v37 }
 0x110   :  { %161 = vrcp.f32 %v148_v39  ;;  %v82_v41 = vmul.f32 %v160_v30, %v81_v40  ;;  %v103_v50 = vand.u32 2147483648, %v148_v39  ;;  %v101_v52 = vand.u32 2147483647, %v148_v39 }
 0x111   :  { %vm97_vm7 = vweird.f32 %v148_v39 }
 0x112   :  { %v83_v42 = vmul.f32 %v82_v41, %v64_v25  ;;  %v104_v56 = vor.u32 1.1754944e-38, %v103_v50  ;;  %vm102_vm9 = vcmp.eq.f32.partialorder %v101_v52, 8.507059e+37 }
 0x114   :  { %v85_v44 = vsel %vm84_vm4, %v64_v25, %v83_v42 }
 0x115   :  { %v88_v45 = vsel %vm86_vm5, %v87_v43, %v85_v44 }
 0x116   :  { %v162_v46 = vpop.eup %161  ;;  %v149_v47 = vadd.f32 -1e-06, %v88_v45 }
 0x117   :  { %v93_v48 = vmul.f32 %v162_v46, %v148_v39  ;;  %vm98_vm6 = vweird.f32 %v162_v46 }
 0x118   :  { %163 = vrcp.f32 %v149_v47  ;;  %vm99_vm8 = vmor %vm97_vm7, %vm98_vm6  ;;  %v118_v62 = vand.u32 2147483648, %v149_v47  ;;  %v116_v1 = vand.u32 2147483647, %v149_v47  ;;  %vm112_vm11 = vweird.f32 %v149_v47 }
 0x119   :  { %v94_v49 = vsub.f32 1.0, %v93_v48 }
 0x11a   :  { %v119_v5 = vor.u32 1.1754944e-38, %v118_v62  ;;  %vm117_vm13 = vcmp.eq.f32.partialorder %v116_v1, 8.507059e+37 }
 0x11b   :  { %v95_v51 = vmul.f32 %v162_v46, %v94_v49 }
 0x11d   :  { %v96_v53 = vadd.f32 %v162_v46, %v95_v51 }
 0x11e   :  { %v164_v54 = vpop.eup %163 }
 0x11f   :  { %v100_v57 = vsel %vm99_vm8, %v162_v46, %v96_v53  ;;  %v108_v58 = vmul.f32 %v164_v54, %v149_v47  ;;  %vm113_vm10 = vweird.f32 %v164_v54 }
 0x120   :  { %v105_v59 = vsel %vm102_vm9, %v104_v56, %v100_v57  ;;  %vm114_vm12 = vmor %vm112_vm11, %vm113_vm10 }
 0x121   :  { %v106_v60 = vmul.f32 %v105_v59, %v91_v55  ;;  %v109_v61 = vsub.f32 1.0, %v108_v58 }
 0x123   :  { %v110_v0 = vmul.f32 %v164_v54, %v109_v61  ;;  %v122_v2 = vmul.f32 %v106_v60, %v250_v13 }
 0x125   :  { %v111_v3 = vadd.f32 %v164_v54, %v110_v0  ;;  %v125_v4 = vadd.f32 %v124_v63, %v122_v2 }
 0x127   :  { %v115_v6 = vsel %vm114_vm12, %v164_v54, %v111_v3  ;;  %127 = vst.msk [vmem:[#allocation7] sm:$0xff] %vm37_vm0, %v125_v4 }
 0x128   :  { %v120_v7 = vsel %vm117_vm13, %v119_v5, %v115_v6 }
 0x129   :  { %v121_v8 = vmul.f32 %v120_v7, %v91_v55 }
 0x12b   :  { %v123_v9 = vmul.f32 %v121_v8, %v255_v18 }
 0x12d   :  { %v126_v10 = vadd.f32 %v124_v63, %v123_v9 }
 0x12f   :  { %128 = vst.msk [vmem:[#allocation7 + $0x8] sm:$0xff] %vm37_vm0, %v126_v10 }
 0x130   :  { %141 = dma.vmem_to_hbm [thread:$0]  %s134_s22, 256, %s136_s24, [#allocation6], %s218_s17, %s218_s17, %s219_s18  }
 0x131   :  { %215 = dma.done.wait [#allocation6], 256  }
 0x132   :  { %216 = vsyncadd [#allocation6], 4294967040 }
 0x133   :  { %146 = vsyncpa [#allocation5], 1 }
 0x134   :  { %147 = vsyncpa [#allocation6], 1 }

</bundles_post_ra>
